<compile_context>
chip_gen: v7x
topology: tpu7x:2x2x1
jax: 0.10.0
libtpu: 0.0.40
codegen_flags: <defaults>
</compile_context>

<pallas_src>
import jax
import jax.numpy as jnp
from jax.experimental import pallas as pl
from jax.experimental.pallas import tpu as pltpu


def _round_up(x: int, m: int) -> int:
    return (x + m - 1) // m * m


# ---------------------------------------------------------------------------
# Kernels
# ---------------------------------------------------------------------------
def _linear_kernel_single_k(x_ref, w_ref, b_ref, o_ref):
    """Single-K fast path: one MXU dot, bias add, store.  No scratch."""
    x = x_ref[...].astype(w_ref.dtype)  # bf16 feed to the MXU (cast in VMEM)
    acc = jnp.dot(x, w_ref[...], preferred_element_type=jnp.float32)
    o_ref[...] = (acc + b_ref[...].astype(jnp.float32)).astype(o_ref.dtype)


def _linear_kernel_multi_k(x_ref, w_ref, b_ref, o_ref, acc_ref):
    """Multi-K path: f32 VMEM accumulator over the trailing (arbitrary) K axis."""
    k = pl.program_id(2)

    @pl.when(k == 0)
    def _():
        acc_ref[...] = jnp.zeros_like(acc_ref)

    x = x_ref[...].astype(w_ref.dtype)
    acc_ref[...] += jnp.dot(x, w_ref[...], preferred_element_type=jnp.float32)

    @pl.when(k == pl.num_programs(2) - 1)
    def _():
        o_ref[...] = (acc_ref[...] + b_ref[...].astype(jnp.float32)).astype(
            o_ref.dtype
        )


# ---------------------------------------------------------------------------
# Padding-aware tile selection
# ---------------------------------------------------------------------------
_M_LADDER = (512, 448, 384, 320, 256, 192, 128, 96, 64, 48, 32, 16)
_K_LADDER = (1024, 768, 512, 384, 256, 128)


def _pick_m_tile(b: int) -> tuple[int, int]:
    """Return (tm, M_padded)."""
    if b <= 512:
        # Full-extent block: no (8,128) divisibility requirement, no padding.
        if b >= 256 and b % 32 == 0:
            # Two zero-padding M tiles -> both v7x TensorCores get work.
            return b // 2, b
        return b, b
    exact = [t for t in _M_LADDER if b % t == 0]
    if exact:
        return exact[0], b  # largest exact divisor -> zero padding, no x copy
    # Padding unavoidable: minimise it, then prefer the bigger tile.
    t = min(_M_LADDER, key=lambda t: (_round_up(b, t) - b, -t))
    return t, _round_up(b, t)


def _pick_k_tile(f: int) -> tuple[int, int]:
    """Return (tk, K_padded)."""
    if f <= 2048:
        return f, f  # single full-extent K block -> fast path, no padding
    exact = [t for t in _K_LADDER if f % t == 0]
    if exact:
        return exact[0], f
    t = min(_K_LADDER, key=lambda t: (_round_up(f, t) - f, -t))
    return t, _round_up(f, t)


def _pick_n_tile(n_padded: int) -> int:
    if n_padded <= 512:
        return n_padded  # stream x once; single unmasked lane-dense store
    for t in (512, 384, 256):
        if n_padded % t == 0:
            return t
    return 128


# ---------------------------------------------------------------------------
# Wrapper
# ---------------------------------------------------------------------------
def logreg_forward(
    seq: jax.Array,
    weight: jax.Array,
    bias: jax.Array,
    *,
    compute_dtype=jnp.bfloat16,
) -> jax.Array:
    """Pallas equivalent of nn.Linear(ft_in, nb_classes): seq @ W.T + b.

    seq:    (..., ft_in)          -- leading dims are flattened into a batch.
    weight: (nb_classes, ft_in)   -- PyTorch nn.Linear layout.
    bias:   (nb_classes,)
    returns (..., nb_classes), in seq.dtype.
    """
    *lead, F = seq.shape
    C, F2 = weight.shape
    assert F == F2, "ft_in mismatch between seq and weight"
    assert bias.shape == (C,)

    x2d = seq.reshape(-1, F)
    B = x2d.shape[0]
    out_dtype = seq.dtype

    # ---- Tile / padded-dim selection (padding-minimising). -----------------
    tm, M = _pick_m_tile(B)
    tk, K = _pick_k_tile(F)
    N = _round_up(C, 128)
    tn = _pick_n_tile(N)

    # ---- Operand prep. ------------------------------------------------------
    # Activation: avoid the padding copy whenever possible; cast to bf16
    # inside the kernel instead (no extra HBM pass).  If a pad is unavoidable,
    # fuse the bf16 cast into that single copy.
    if M == B and K == F:
        xp = x2d
    else:
        xp = jnp.zeros((M, K), compute_dtype).at[:B, :F].set(
            x2d.astype(compute_dtype)
        )
    # Weight (small): transpose to (ft_in, nb_classes), pad, cast to bf16.
    wp = jnp.zeros((K, N), compute_dtype).at[:F, :C].set(
        weight.T.astype(compute_dtype)
    )
    # Bias: (1, N) f32, broadcast over rows inside the kernel.
    bp = jnp.zeros((1, N), jnp.float32).at[0, :C].set(bias.astype(jnp.float32))

    # ---- pallas_call. -------------------------------------------------------
    if K == tk:
        # Single K step: no accumulator scratch, 2-D parallel grid.
        grid = (M // tm, N // tn)
        in_specs = [
            pl.BlockSpec((tm, tk), lambda i, j: (i, 0)),   # x tile
            pl.BlockSpec((tk, tn), lambda i, j: (0, j)),   # w tile
            pl.BlockSpec((1, tn), lambda i, j: (0, j)),    # bias tile
        ]
        out_spec = pl.BlockSpec((tm, tn), lambda i, j: (i, j))
        kernel = _linear_kernel_single_k
        scratch = []
        semantics = ("parallel", "parallel")
    else:
        # Reduction axis last; output tile stays resident across K.
        grid = (M // tm, N // tn, K // tk)
        in_specs = [
            pl.BlockSpec((tm, tk), lambda i, j, k: (i, k)),
            pl.BlockSpec((tk, tn), lambda i, j, k: (k, j)),
            pl.BlockSpec((1, tn), lambda i, j, k: (0, j)),
        ]
        out_spec = pl.BlockSpec((tm, tn), lambda i, j, k: (i, j))
        kernel = _linear_kernel_multi_k
        scratch = [pltpu.VMEM((tm, tn), jnp.float32)]
        semantics = ("parallel", "parallel", "arbitrary")

    out_padded = pl.pallas_call(
        kernel,
        out_shape=jax.ShapeDtypeStruct((M, N), out_dtype),
        grid_spec=pltpu.PrefetchScalarGridSpec(
            num_scalar_prefetch=0,
            grid=grid,
            in_specs=in_specs,
            out_specs=out_spec,
            scratch_shapes=scratch,
        ),
        compiler_params=pltpu.CompilerParams(dimension_semantics=semantics),
    )(xp, wp, bp)

    out = out_padded[:B, :C] if (M != B or N != C) else out_padded
    return out.reshape(*lead, C)


if __name__ == "__main__":
    key = jax.random.PRNGKey(0)
    k_seq, k_w = jax.random.split(key)

    # Small shapes consistent with LogReg: batch of node embeddings -> classes.
    B, ft_in, nb_classes = 8, 32, 10
    seq = jax.random.normal(k_seq, (B, ft_in), dtype=jnp.float32)

    # Mimic the module's init: xavier_uniform_ weight, zero bias.
    bound = (6.0 / (ft_in + nb_classes)) ** 0.5
    weight = jax.random.uniform(
        k_w, (nb_classes, ft_in), minval=-bound, maxval=bound, dtype=jnp.float32
    )
    bias = jnp.zeros((nb_classes,), jnp.float32)

    out = logreg_forward(seq, weight, bias)
    out = jax.block_until_ready(out)
    assert out.shape == (B, nb_classes)

    # Reference matching the kernel's numerics: bf16 inputs, f32 accumulation.
    x_b = seq.astype(jnp.bfloat16).astype(jnp.float32)
    w_b = weight.astype(jnp.bfloat16).astype(jnp.float32)
    ref_bf16 = x_b @ w_b.T + bias
    assert jnp.allclose(out, ref_bf16, atol=1e-2, rtol=1e-2), "mismatch vs bf16 ref"

    # Loose sanity check against the full-f32 reference.
    ref_f32 = seq @ weight.T + bias
    assert jnp.allclose(out, ref_f32, atol=1e-1, rtol=1e-1), "mismatch vs f32 ref"

    print("KERNEL_OK")
</pallas_src>

<mosaic_0001>
module attributes {stable_mosaic.version = 11 : i64} {
  func.func @_linear_kernel_single_k(%arg0: i32, %arg1: i32, %arg2: memref<8x32xf32, #tpu.memory_space<vmem>>, %arg3: memref<32x128xbf16, #tpu.memory_space<vmem>>, %arg4: memref<1x128xf32, #tpu.memory_space<vmem>>, %arg5: memref<8x128xf32, #tpu.memory_space<vmem>>) attributes {dimension_semantics = [#tpu.dimension_semantics<parallel>, #tpu.dimension_semantics<parallel>], iteration_bounds = array<i64: 1, 1>, scalar_prefetch = 0 : i64, scratch_operands = 0 : i64, tpu.core_type = #tpu.core_type<tc>, window_params = [{transform_indices = @transform_0, window_bounds = array<i64: 8, 32>}, {transform_indices = @transform_1, window_bounds = array<i64: 32, 128>}, {transform_indices = @transform_2, window_bounds = array<i64: 1, 128>}, {transform_indices = @transform_3, window_bounds = array<i64: 8, 128>}]} {
    %c0 = arith.constant 0 : index
    %c0_0 = arith.constant 0 : index
    %0 = vector.load %arg2[%c0, %c0_0] : memref<8x32xf32, #tpu.memory_space<vmem>>, vector<8x32xf32>
    %1 = arith.truncf %0 : vector<8x32xf32> to vector<8x32xbf16>
    %c0_1 = arith.constant 0 : index
    %c0_2 = arith.constant 0 : index
    %2 = vector.load %arg3[%c0_1, %c0_2] : memref<32x128xbf16, #tpu.memory_space<vmem>>, vector<32x128xbf16>
    %cst = arith.constant dense<0.000000e+00> : vector<8x128xf32>
    %3 = tpu.matmul %1, %2, %cst {dimension_numbers = #tpu.dot_dimension_numbers<[1], [0], [0], [1], [0, 0, 1, 1], [], []>} : vector<8x32xbf16>, vector<32x128xbf16>, vector<8x128xf32> -> vector<8x128xf32>
    %c0_3 = arith.constant 0 : index
    %c0_4 = arith.constant 0 : index
    %4 = vector.load %arg4[%c0_3, %c0_4] : memref<1x128xf32, #tpu.memory_space<vmem>>, vector<1x128xf32>
    %5 = vector.broadcast %4 : vector<1x128xf32> to vector<8x128xf32>
    %6 = arith.addf %3, %5 : vector<8x128xf32>
    %c0_5 = arith.constant 0 : index
    %c0_6 = arith.constant 0 : index
    %7 = vector.load %arg5[%c0_5, %c0_6] : memref<8x128xf32, #tpu.memory_space<vmem>>, vector<8x128xf32>
    tpu.vector_store %arg5[%c0_5, %c0_6], %6 {strides = array<i32>} : memref<8x128xf32, #tpu.memory_space<vmem>>, vector<8x128xf32>,
    return
  }
  func.func @transform_0(%arg0: i32, %arg1: i32) -> (i32, i32) {
    %c0_i32 = arith.constant 0 : i32
    %c0_i32_0 = arith.constant 0 : i32
    return %arg0, %c0_i32 : i32, i32
  }
  func.func @transform_1(%arg0: i32, %arg1: i32) -> (i32, i32) {
    %c0_i32 = arith.constant 0 : i32
    %c0_i32_0 = arith.constant 0 : i32
    return %c0_i32, %arg1 : i32, i32
  }
  func.func @transform_2(%arg0: i32, %arg1: i32) -> (i32, i32) {
    %c0_i32 = arith.constant 0 : i32
    %c0_i32_0 = arith.constant 0 : i32
    return %c0_i32, %arg1 : i32, i32
  }
  func.func @transform_3(%arg0: i32, %arg1: i32) -> (i32, i32) {
    %c0_i32 = arith.constant 0 : i32
    return %arg0, %arg1 : i32, i32
  }
}

</mosaic_0001>

<bundles_post_ra>
// kernel: tpu_custom_call.1
= control target key start
LH: loop header
LB: loop body
LE: loop exit
PB: predicated region body
PF: predicated region fallthrough
CT: control target
= control target key end

     0   :  { %8 = vsyncpa [#allocation3], 0  ;;  %s297_s0 = inlined_call_operand.hbm [shape: f32[8,32], index: 0, kind: input, shape index: {}]   ;;  %s298_s1 = inlined_call_operand.hbm [shape: bf16[32,128], index: 1, kind: input, shape index: {}]   ;;  %s299_s2 = inlined_call_operand.vmem [shape: f32[1,128], index: 2, kind: input, shape index: {}]   ;;  %s300_s3 = inlined_call_operand.hbm [shape: f32[8,128], index: 3, kind: output, shape index: {}]  }
   0x1   :  { %9 = vsyncpa [#allocation6], 0 }
   0x2   :  { %10 = vsyncpa [#allocation4], 0  ;;  %s224_s12 = smov [#allocation2]   ;;  %s225_s14 = smov [#allocation5]  }
   0x3   :  { %s17_s13 = sshll.u32 %s224_s12, 4  ;;  %s26_s15 = sshll.u32 %s225_s14, 4  ;;  %s18_s13 = int_to_ptr.vmem [resolvable:$true] %s17_s13  ;;  %s251_s15 = int_to_ptr.vmem [resolvable:$true] %s26_s15 }
   0x4   :  { %s152_s18 = scalar_lea.hbm %s297_s0, 128 }
   0x5   :  { %p153_p0 = scmp.ne.s32.totalorder %s297_s0, %s152_s18  ;;  %p156_p1 = scmp.lt.u32.totalorder %s152_s18, %s297_s0 }
   0x7   :  { %p158_p2 = pnand %p156_p1, %p153_p0 }
   0x9   :  { %161 = shalt.err (!%p158_p2)
}
   0xa   :  { %s162_s23 = scalar_lea.vmem %s18_s13, 128  ;;  %p167_p4 = scmp.lt.s32.totalorder %s18_s13, %s18_s13 }
   0xb   :  { %p163_p3 = scmp.ne.s32.totalorder %s18_s13, %s162_s23  ;;  %p168_p5 = scmp.lt.s32.totalorder %s162_s23, %s162_s23 }
   0xd   :  { %p169_p6 = por %p168_p5, %p167_p4 }
   0xf   :  { %p170_p7 = pnand %p169_p6, %p163_p3 }
  0x11   :  { %173 = shalt.err (!%p170_p7)
}
  0x12   :  { %20 = dma.hbm_to_vmem [thread:$0]  %s297_s0, 128, %s18_s13, [#allocation3]  }
  0x13   :  { %s174_s28 = scalar_lea.hbm %s298_s1, 256 }
  0x14   :  { %p175_p8 = scmp.ne.s32.totalorder %s298_s1, %s174_s28  ;;  %p178_p9 = scmp.lt.u32.totalorder %s174_s28, %s298_s1 }
  0x16   :  { %p180_p10 = pnand %p178_p9, %p175_p8 }
  0x18   :  { %183 = shalt.err (!%p180_p10)
}
  0x19   :  { %s184_s6 = scalar_lea.vmem %s251_s15, 256  ;;  %p189_p12 = scmp.lt.s32.totalorder %s251_s15, %s251_s15 }
  0x1a   :  { %p185_p11 = scmp.ne.s32.totalorder %s251_s15, %s184_s6  ;;  %p190_p13 = scmp.lt.s32.totalorder %s184_s6, %s184_s6 }
  0x1c   :  { %p191_p0 = por %p190_p13, %p189_p12 }
  0x1e   :  { %p192_p1 = pnand %p191_p0, %p185_p11 }
  0x20   :  { %195 = shalt.err (!%p192_p1)
}
  0x21   :  { %s226_s0 = smov 64   ;;  %s227_s7 = smov 4  }
  0x22   :  { %32 = dma.hbm_to_vmem [thread:$0]  %s298_s1, 256, %s251_s15, [#allocation6], %s226_s0, %s226_s0, %s227_s7  }
  0x23   :  { %218 = dma.done.wait [#allocation3], 128  }
  0x24   :  { %219 = vsyncadd [#allocation3], 4294967168 }
  0x25   :  { %220 = dma.done.wait [#allocation6], 256  }
  0x26   :  { %221 = vsyncadd [#allocation6], 4294967040  ;;  %v228_v0 = vmov 0.0   ;;  %vm229_vm0 = vmmov 0   ;;  %v150_v1 = vld [vmem:[#allocation5] sm:$0xff]   ;;  %v151_v2 = vld [vmem:[#allocation5 + $0x8] sm:$0xff]  }
  0x27   :  { %135 = vmatprep.subr.bf16.mxu0 %v228_v0  ;;  %139 = vmatprep.mubr.msk.bf16.mxu0 %vm229_vm0, %v228_v0  ;;  %v42_v3 = vld [vmem:[#allocation2] sm:$0xff]  ;;  %vm67_vm1 = vcmask 261120   ;;  %s230_s1 = smov [#allocation7]  }
  0x28   :  { %136 = vmatpush3.bf16.msra.mxu0 %v150_v1  ;;  %v43_v4 = vpack.c.bf16 %v42_v3, %v42_v3  ;;  %v128_v5 = vld [vmem:[%s299_s2] ss:$0 sm:$0xff]  ;;  %s118_s12 = sshll.u32 %s230_s1, 4  ;;  %s119_s12 = int_to_ptr.vmem [resolvable:$true] %s118_s12 }
  0x29   :  { %137 = vmatprep.subr.bf16.mxu0 %v228_v0  ;;  %s196_s13 = scalar_lea.vmem %s119_s12, 128  ;;  %p201_p3 = scmp.lt.s32.totalorder %s119_s12, %s119_s12 }
  0x2a   :  { %p197_p2 = scmp.ne.s32.totalorder %s119_s12, %s196_s13  ;;  %p202_p4 = scmp.lt.s32.totalorder %s196_s13, %s196_s13 }
  0x2c   :  { %138 = vmatpush3.bf16.msra.mxu0 %v151_v2  ;;  %p203_p5 = por %p202_p4, %p201_p3 }
  0x2e   :  { %p204_p6 = pnand %p203_p5, %p197_p2 }
  0x2f   :  { %140 = vmatmul.mubr.msk.bf16.vlgmr.msra.gmra.mrb[0].mxu0 %vm67_vm1, %v43_v4 }
 0x102   :  { %v105_v6 = vpop.f32.mrb[0].mxu0 }
 0x103   :  { %v106_v7 = vadd.f32 %v128_v5, %v105_v6  ;;  %v141_v8 = vpop.f32.mrb[1].mxu0 }
 0x104   :  { %v108_v9 = vpop.f32.mrb[2].mxu0 }
 0x105   :  { %111 = vst [vmem:[#allocation7] sm:$0xff] %v106_v7  ;;  %v142_v10 = vpop.f32.mrb[3].mxu0 }
 0x106   :  { %207 = shalt.err (!%p204_p6)
}
 0x107   :  { %s208_s2 = scalar_lea.hbm %s300_s3, 128 }
 0x108   :  { %p209_p7 = scmp.ne.s32.totalorder %s300_s3, %s208_s2  ;;  %p212_p8 = scmp.lt.u32.totalorder %s208_s2, %s300_s3 }
 0x10a   :  { %p214_p9 = pnand %p212_p8, %p209_p7 }
 0x10c   :  { %217 = shalt.err (!%p214_p9)
}
 0x10d   :  { %121 = dma.vmem_to_hbm [thread:$0]  %s119_s12, 128, %s300_s3, [#allocation4]  }
 0x10e   :  { %222 = dma.done.wait [#allocation4], 128  }
 0x10f   :  { %223 = vsyncadd [#allocation4], 4294967168 }
 0x110   :  { %125 = vsyncpa [#allocation3], 1 }
 0x111   :  { %126 = vsyncpa [#allocation6], 1 }
 0x112   :  { %127 = vsyncpa [#allocation4], 1 }

</bundles_post_ra>
